<compile_context>
chip_gen: v5e
topology: v5e:2x2
jax: 0.10.0
libtpu: 0.0.40
codegen_flags: <defaults>
</compile_context>

<pallas_src>
import math
import functools

import jax
import jax.numpy as jnp
from jax.experimental import pallas as pl
from jax.experimental.pallas import tpu as pltpu


# ----------------------------------------------------------------------------
# Fixed sinusoidal PE table (the module's buffer), kept in float32.
# ----------------------------------------------------------------------------
def make_pe_table(d_model: int, max_len: int = 240) -> jnp.ndarray:
    position = jnp.arange(0, max_len, dtype=jnp.float32)[:, None]            # (max_len, 1)
    div_term = jnp.exp(jnp.arange(0, d_model, 2, dtype=jnp.float32)
                       * (-(math.log(10000.0) / d_model)))                   # (d_model/2,)
    pe = jnp.zeros((max_len, d_model), dtype=jnp.float32)
    pe = pe.at[:, 0::2].set(jnp.sin(position * div_term))
    pe = pe.at[:, 1::2].set(jnp.cos(position * div_term))
    return pe                                                                # (max_len, d_model)


# ----------------------------------------------------------------------------
# Kernels (lane-dense 2-D blocks: (TB, S*D)); add in f32, cast on store.
# ----------------------------------------------------------------------------
def _pe_eval_kernel(x_ref, pe_ref, o_ref):
    y = x_ref[...].astype(jnp.float32) + pe_ref[...]
    o_ref[...] = y.astype(o_ref.dtype)


def _pe_train_prng_kernel(seed_ref, x_ref, pe_ref, o_ref, *,
                          keep_threshold: int, scale: float):
    # Dropout bits generated on-chip: no HBM traffic for the mask.
    pltpu.prng_seed(seed_ref[0] + pl.program_id(0))       # distinct stream per block
    bits = pltpu.prng_random_bits(x_ref.shape)
    if jnp.dtype(bits.dtype) != jnp.dtype(jnp.uint32):
        bits = pltpu.bitcast(bits, jnp.uint32)
    keep = bits < jnp.asarray(keep_threshold, dtype=jnp.uint32)
    y = x_ref[...].astype(jnp.float32) + pe_ref[...]
    o_ref[...] = jnp.where(keep, y * scale, 0.0).astype(o_ref.dtype)


def _pe_train_bits_kernel(x_ref, pe_ref, bits_ref, o_ref, *,
                          keep_threshold: int, scale: float):
    # Fallback: raw uint32 bits streamed from the wrapper, uint32 threshold
    # (no extra shift/convert pass, no clamp bias).
    keep = bits_ref[...] < jnp.asarray(keep_threshold, dtype=jnp.uint32)
    y = x_ref[...].astype(jnp.float32) + pe_ref[...]
    o_ref[...] = jnp.where(keep, y * scale, 0.0).astype(o_ref.dtype)


# ----------------------------------------------------------------------------
# One-time probe: is the in-kernel stateful PRNG usable on this backend?
# (Not available in some interpret paths -> fall back to streamed bits.)
# ----------------------------------------------------------------------------
@functools.lru_cache(maxsize=1)
def _in_kernel_prng_available() -> bool:
    def probe(seed_ref, o_ref):
        pltpu.prng_seed(seed_ref[0])
        bits = pltpu.prng_random_bits(o_ref.shape)
        if jnp.dtype(bits.dtype) != jnp.dtype(jnp.uint32):
            bits = pltpu.bitcast(bits, jnp.uint32)
        o_ref[...] = bits

    try:
        out = pl.pallas_call(
            probe,
            out_shape=jax.ShapeDtypeStruct((8, 128), jnp.uint32),
            in_specs=[pl.BlockSpec(memory_space=pltpu.MemorySpace.SMEM)],
            out_specs=pl.BlockSpec(memory_space=pltpu.MemorySpace.VMEM),
        )(jnp.zeros((1,), jnp.int32))
        jax.block_until_ready(out)
        return True
    except Exception:
        return False


# ----------------------------------------------------------------------------
# Tile-size selection.
# ----------------------------------------------------------------------------
_TILE_BUDGET_BYTES = 16 * 1024 * 1024      # per-step x + out (+ bits), pre double-buffer
_SUBLANE_PACK = {4: 8, 2: 16, 1: 32}       # sublane packing per dtype itemsize


def _pick_tb(batch: int, n_flat: int, x_bytes: int, with_bits: bool) -> int:
    per_row = n_flat * (2 * x_bytes + (4 if with_bits else 0))   # x + out (+ u32 bits)
    vmem_rows = max(1, _TILE_BUDGET_BYTES // (2 * per_row))      # 2x: double buffering
    sub = _SUBLANE_PACK.get(x_bytes, 8)
    if batch <= min(vmem_rows, sub):
        return batch                        # one block, block dim == full array dim
    if vmem_rows < sub:
        return min(batch, sub)              # VMEM-bound: smallest aligned tile
    # Cap so the "parallel" grid axis has >= 2 steps (v7x: 2 TensorCores per chip).
    target = min(vmem_rows, pl.cdiv(batch, 2))
    tb = min(batch, sub * max(1, target // sub))
    # Prefer a TB that divides the batch evenly (avoids a ragged, masked last block).
    c = tb
    while c >= sub:
        if batch % c == 0:
            return c
        c -= sub
    return tb


# ----------------------------------------------------------------------------
# Wrapper
# ----------------------------------------------------------------------------
def positional_encoding(x: jnp.ndarray,
                        pe_table: jnp.ndarray,
                        *,
                        dropout_p: float = 0.1,
                        training: bool = False,
                        rng_key=None) -> jnp.ndarray:
    """x: (B, S, D).  pe_table: (max_len, D), float32."""
    B, S, D = x.shape
    assert pe_table.shape[1] == D and pe_table.shape[0] >= S
    N = S * D

    use_dropout = training and dropout_p > 0.0
    if use_dropout and dropout_p >= 1.0:
        return jnp.zeros_like(x)            # nn.Dropout(p=1) zeroes everything
    if use_dropout and rng_key is None:
        raise ValueError("training-mode dropout requires an explicit rng_key")

    x2 = x.reshape(B, N)                                       # lane-dense layout
    pe2 = pe_table[:S, :].astype(jnp.float32).reshape(1, N)    # resident f32 row

    x_bytes = jnp.dtype(x.dtype).itemsize
    use_prng = use_dropout and _in_kernel_prng_available()
    with_bits = use_dropout and not use_prng

    TB = _pick_tb(B, N, x_bytes, with_bits)
    grid = (pl.cdiv(B, TB),)

    row_spec = pl.BlockSpec((TB, N), lambda b: (b, 0))
    pe_spec = pl.BlockSpec((1, N), lambda b: (0, 0))           # resident across steps

    tile_bytes = TB * N * (2 * x_bytes + (4 if with_bits else 0)) + 4 * N
    vmem_limit = int(min(48 * 1024 * 1024, max(32 * 1024 * 1024, 2.5 * tile_bytes)))
    compiler_params = pltpu.CompilerParams(
        dimension_semantics=("parallel",),                     # shard across TCs (v7x)
        vmem_limit_bytes=vmem_limit,
    )

    if not use_dropout:
        out2 = pl.pallas_call(
            _pe_eval_kernel,
            out_shape=jax.ShapeDtypeStruct((B, N), x.dtype),
            grid=grid,
            in_specs=[row_spec, pe_spec],
            out_specs=row_spec,
            compiler_params=compiler_params,
        )(x2, pe2)
        return out2.reshape(B, S, D)

    # Inverted dropout: keep element iff uniform u32 < (1-p) * 2^32.
    keep_threshold = min(int(round((1.0 - dropout_p) * 2.0 ** 32)), 2 ** 32 - 1)
    scale = 1.0 / (1.0 - dropout_p)

    if use_prng:
        seed = jax.random.randint(rng_key, (1,), 0, jnp.iinfo(jnp.int32).max,
                                  dtype=jnp.int32)
        kernel = functools.partial(_pe_train_prng_kernel,
                                   keep_threshold=keep_threshold, scale=scale)
        out2 = pl.pallas_call(
            kernel,
            out_shape=jax.ShapeDtypeStruct((B, N), x.dtype),
            grid=grid,
            in_specs=[pl.BlockSpec(memory_space=pltpu.MemorySpace.SMEM),
                      row_spec, pe_spec],
            out_specs=row_spec,
            compiler_params=compiler_params,
        )(seed, x2, pe2)
    else:
        # Interpret-mode fallback: stream raw uint32 bits (no extra XLA passes).
        bits = jax.random.bits(rng_key, (B, N), dtype=jnp.uint32)
        kernel = functools.partial(_pe_train_bits_kernel,
                                   keep_threshold=keep_threshold, scale=scale)
        out2 = pl.pallas_call(
            kernel,
            out_shape=jax.ShapeDtypeStruct((B, N), x.dtype),
            grid=grid,
            in_specs=[row_spec, pe_spec, row_spec],
            out_specs=row_spec,
            compiler_params=compiler_params,
        )(x2, pe2, bits)

    return out2.reshape(B, S, D)


# ----------------------------------------------------------------------------
# Demo / self-check
# ----------------------------------------------------------------------------
if __name__ == "__main__":
    B, S, D = 2, 8, 32          # batch, seq_len, d_model
    MAX_LEN = 240
    DROPOUT_P = 0.1

    key = jax.random.PRNGKey(0)
    x = jax.random.normal(key, (B, S, D), dtype=jnp.float32)
    pe_table = make_pe_table(D, MAX_LEN)

    # Eval mode: dropout is identity -> exact reference check.
    out_eval = positional_encoding(x, pe_table, dropout_p=DROPOUT_P, training=False)
    out_eval = jax.block_until_ready(out_eval)
    ref = x + pe_table[None, :S, :]
    assert jnp.allclose(out_eval, ref, atol=1e-6, rtol=1e-6), "eval-mode mismatch"

    # Training mode: every output element is either 0 (dropped) or ref * 1/(1-p).
    out_train = positional_encoding(x, pe_table, dropout_p=DROPOUT_P,
                                    training=True, rng_key=jax.random.PRNGKey(123))
    out_train = jax.block_until_ready(out_train)
    assert out_train.shape == (B, S, D)
    scaled_ref = ref / (1.0 - DROPOUT_P)
    ok = jnp.isclose(out_train, 0.0, atol=1e-6) | jnp.isclose(out_train, scaled_ref,
                                                              atol=1e-5, rtol=1e-5)
    assert bool(jnp.all(ok)), "training-mode values are neither dropped nor scaled"

    print("KERNEL_OK")
</pallas_src>

<mosaic_0001>
module attributes {stable_mosaic.version = 11 : i64} {
  func.func @_pe_eval_kernel(%arg0: i32, %arg1: memref<2x256xf32, #tpu.memory_space<vmem>>, %arg2: memref<1x256xf32, #tpu.memory_space<vmem>>, %arg3: memref<2x256xf32, #tpu.memory_space<vmem>>) attributes {dimension_semantics = [#tpu.dimension_semantics<parallel>], iteration_bounds = array<i64: 1>, scalar_prefetch = 0 : i64, scratch_operands = 0 : i64, tpu.core_type = #tpu.core_type<tc>, window_params = [{transform_indices = @transform_0, window_bounds = array<i64: 2, 256>}, {pipeline_mode = #tpu.pipeline_mode<synchronous>, transform_indices = @transform_1, window_bounds = array<i64: 1, 256>}, {transform_indices = @transform_2, window_bounds = array<i64: 2, 256>}]} {
    %c0 = arith.constant 0 : index
    %c0_0 = arith.constant 0 : index
    %0 = vector.load %arg1[%c0, %c0_0] : memref<2x256xf32, #tpu.memory_space<vmem>>, vector<2x256xf32>
    %c0_1 = arith.constant 0 : index
    %c0_2 = arith.constant 0 : index
    %1 = vector.load %arg2[%c0_1, %c0_2] : memref<1x256xf32, #tpu.memory_space<vmem>>, vector<1x256xf32>
    %2 = vector.broadcast %1 : vector<1x256xf32> to vector<2x256xf32>
    %3 = arith.addf %0, %2 : vector<2x256xf32>
    %c0_3 = arith.constant 0 : index
    %c0_4 = arith.constant 0 : index
    %4 = vector.load %arg3[%c0_3, %c0_4] : memref<2x256xf32, #tpu.memory_space<vmem>>, vector<2x256xf32>
    tpu.vector_store %arg3[%c0_3, %c0_4], %3 {strides = array<i32>} : memref<2x256xf32, #tpu.memory_space<vmem>>, vector<2x256xf32>,
    return
  }
  func.func @transform_0(%arg0: i32) -> (i32, i32) {
    %c0_i32 = arith.constant 0 : i32
    %c0_i32_0 = arith.constant 0 : i32
    return %arg0, %c0_i32 : i32, i32
  }
  func.func @transform_1(%arg0: i32) -> (i32, i32) {
    %c0_i32 = arith.constant 0 : i32
    %c0_i32_0 = arith.constant 0 : i32
    %c0_i32_1 = arith.constant 0 : i32
    return %c0_i32, %c0_i32_0 : i32, i32
  }
  func.func @transform_2(%arg0: i32) -> (i32, i32) {
    %c0_i32 = arith.constant 0 : i32
    %c0_i32_0 = arith.constant 0 : i32
    return %arg0, %c0_i32 : i32, i32
  }
}

</mosaic_0001>

<bundles_post_ra>
// kernel: tpu_custom_call.1
= control target key start
LH: loop header
LB: loop body
LE: loop exit
PB: predicated region body
PF: predicated region fallthrough
CT: control target
= control target key end

     0   :  { %7 = vsyncpa [#allocation3], 0  ;;  %s177_s0 = inlined_call_operand.hbm [shape: f32[2,256], index: 0, kind: input, shape index: {}]   ;;  %s178_s1 = inlined_call_operand.hbm [shape: f32[1,256], index: 1, kind: input, shape index: {}]   ;;  %s179_s2 = inlined_call_operand.hbm [shape: f32[2,256], index: 2, kind: output, shape index: {}]  }
   0x1   :  { %8 = vsyncpa [#allocation6], 0 }
   0x2   :  { %9 = vsyncpa [#allocation4], 0  ;;  %s15_s11 = sshll.u32 %s177_s0, 4  ;;  %s150_s12 = smov [#allocation2]   ;;  %s16_s11 = int_to_ptr.hbm [resolvable:$true] %s15_s11 }
   0x3   :  { %s17_s13 = sshll.u32 %s150_s12, 4  ;;  %s26_s16 = sshll.u32 %s178_s1, 4  ;;  %s18_s13 = int_to_ptr.vmem [resolvable:$true] %s17_s13  ;;  %s27_s16 = int_to_ptr.hbm [resolvable:$true] %s26_s16 }
   0x4   :  { %20 = dma.hbm_to_vmem [thread:$0]  %s16_s11, 64, %s18_s13, [#allocation3]  }
   0x5   :  { %s151_s17 = smov [#allocation5]  }
   0x6   :  { %s28_s18 = sshll.u32 %s151_s17, 4  ;;  %s29_s18 = int_to_ptr.vmem [resolvable:$true] %s28_s18 }
   0x7   :  { %31 = dma.hbm_to_vmem [thread:$0]  %s27_s16, 32, %s29_s18, [#allocation6]  }
   0x8   :  { %144 = dma.done.wait [#allocation3], 64  }
   0x9   :  { %145 = vsyncadd [#allocation3], 4294967232 }
   0xa   :  { %146 = dma.done.wait [#allocation6], 32  }
   0xb   :  { %147 = vsyncadd [#allocation6], 4294967264  ;;  %v41_v0 = vld [vmem:[#allocation5] sm:$0x3]  ;;  %vm46_vm0 = vcmask 1041408   ;;  %s152_s0 = smov [#allocation7]  }
   0xc   :  { %v43_v1 = vperm.slane %v41_v0, 0  ;;  %v44_v2 = vperm.slane %v41_v0, 1  ;;  %v40_v3 = vld [vmem:[#allocation2] sm:$0xf]  ;;  %s56_s19 = sshll.u32 %s152_s0, 4  ;;  %s58_s21 = sshll.u32 %s179_s2, 4  ;;  %s57_s19 = int_to_ptr.vmem [resolvable:$true] %s56_s19  ;;  %s59_s21 = int_to_ptr.hbm [resolvable:$true] %s58_s21 }
   0xe   :  { %v45_v4 = vrot.slane %v44_v2, 6 }
  0x10   :  { %v47_v5 = vsel %vm46_vm0, %v43_v1, %v45_v4 }
  0x11   :  { %v49_v6 = vadd.f32 %v47_v5, %v40_v3 }
  0x13   :  { %50 = vst [vmem:[#allocation7] sm:$0xf] %v49_v6 }
  0x14   :  { %61 = dma.vmem_to_hbm [thread:$0]  %s57_s19, 64, %s59_s21, [#allocation4]  }
  0x15   :  { %148 = dma.done.wait [#allocation4], 64  }
  0x16   :  { %149 = vsyncadd [#allocation4], 4294967232 }
  0x17   :  { %66 = vsyncpa [#allocation3], 1 }
  0x18   :  { %67 = vsyncpa [#allocation6], 1 }
  0x19   :  { %68 = vsyncpa [#allocation4], 1 }

</bundles_post_ra>
